<compile_context>
chip_gen: v7x
topology: tpu7x:2x2x1
jax: 0.10.0
libtpu: 0.0.40
codegen_flags: <defaults>
</compile_context>

<pallas_src>
import functools

import jax
import jax.numpy as jnp
from jax.experimental import pallas as pl
from jax.experimental.pallas import tpu as pltpu


_PAD_LOGIT = -1e4  # large finite negative; -inf would produce NaN via x * t


def _round_up(x, m):
    return ((x + m - 1) // m) * m


# ----------------------------- Pallas hot path ------------------------------ #

def _mask_bce_kernel(x_ref, t_ref, out_ref, *, tp, acc_rows):
    """Partial sum of elementwise BCE-with-logits over one (tp, mm_pad) tile,
    folded into an (acc_rows, mm_pad) block; the tiny final reduction and mean
    normalization happen in the wrapper."""
    mm = out_ref.shape[-1]
    n_slabs = tp // acc_rows

    def body(i, acc):
        r0 = pl.multiple_of(i * acc_rows, acc_rows)
        x = x_ref[pl.ds(r0, acc_rows), :].astype(jnp.float32)
        t = t_ref[pl.ds(r0, acc_rows), :].astype(jnp.float32)
        # numerically stable binary_cross_entropy_with_logits, fused per slab:
        #   max(x, 0) - x*t + log(1 + exp(-|x|))
        bce = jnp.maximum(x, 0.0) - x * t + jnp.log1p(jnp.exp(-jnp.abs(x)))
        return acc + bce

    acc0 = jnp.zeros((acc_rows, mm), jnp.float32)
    out_ref[...] = jax.lax.fori_loop(0, n_slabs, body, acc0, unroll=True)


def _choose_tp(p_bucket):
    """Row-tile size: aim for >= 4 grid steps when there is enough work (v7x
    2-TC split + DMA/compute overlap), with a generation-aware cap."""
    try:
        vmem_bytes = pltpu.get_tpu_info().vmem_capacity_bytes
    except Exception:  # info unavailable -> conservative cap, safe everywhere
        vmem_bytes = 64 * 1024 * 1024
    cap = 512 if vmem_bytes <= 64 * 1024 * 1024 else 1024  # v7x vs v5e/v6e
    tp = max(128, p_bucket // 4)
    return min(cap, tp, p_bucket)


def mask_loss_pallas(gathered_logits, mask_targets):
    """mean BCE-with-logits over already-gathered logits vs mask targets.

    gathered_logits: (num_pos, M, M), native dtype (f32 / bf16)
    mask_targets:    (num_pos, M, M), values in {0, 1}
    """
    num_pos = int(gathered_logits.shape[0])
    mh, mw = gathered_logits.shape[-2:]
    mm = mh * mw
    mm_pad = _round_up(mm, 128)                      # lane-dense last dim

    x = gathered_logits.reshape(num_pos, mm)
    # bf16 targets are exact for {0,1} and halve target HBM traffic
    t = mask_targets.reshape(num_pos, mm).astype(jnp.bfloat16)

    # bucket rows to a power of two (>=128): small static set of compiled shapes
    p_bucket = max(128, int(pl.next_power_of_2(num_pos)))
    tp = _choose_tp(p_bucket)
    num_blocks = p_bucket // tp

    # pad rows & lanes: logits -> -1e4, targets -> 0  =>  padded BCE is exactly 0
    x = jnp.pad(x, ((0, p_bucket - num_pos), (0, mm_pad - mm)),
                constant_values=_PAD_LOGIT)
    t = jnp.pad(t, ((0, p_bucket - num_pos), (0, mm_pad - mm)))

    acc_rows = 32 if mm_pad <= 512 else 16   # keep the live accumulator small
    kernel = functools.partial(_mask_bce_kernel, tp=tp, acc_rows=acc_rows)
    partials = pl.pallas_call(
        kernel,
        out_shape=jax.ShapeDtypeStruct((num_blocks * acc_rows, mm_pad),
                                       jnp.float32),
        grid_spec=pltpu.PrefetchScalarGridSpec(
            num_scalar_prefetch=0,
            grid=(num_blocks,),
            in_specs=[
                pl.BlockSpec((tp, mm_pad), lambda p: (p, 0)),
                pl.BlockSpec((tp, mm_pad), lambda p: (p, 0)),
            ],
            out_specs=pl.BlockSpec((acc_rows, mm_pad), lambda p: (p, 0)),
        ),
        compiler_params=pltpu.CompilerParams(
            dimension_semantics=("parallel",)),
    )(x, t)
    # tiny final reduction + mean over the TRUE (unpadded) element count
    return jnp.sum(partials) / jnp.float32(num_pos * mm)


# ------------------------------- JAX glue ----------------------------------- #

def _project_masks_on_boxes(seg_masks, boxes_yxyx, disc_size):
    """Crop each full-image binary instance mask to its proposal box and resize
    the crop to `disc_size` (nearest-neighbor sampling -> {0,1} mask tensor)."""
    # TODO(synk): polygon-mask rasterization / bilinear+threshold resize variants
    # of AbstractMaskList are not reproduced; binary full-image masks assumed.
    mh, mw = disc_size
    h, w = seg_masks.shape[-2:]

    def one(mask, box):
        y1, x1, y2, x2 = box[0], box[1], box[2], box[3]
        ys = y1 + (jnp.arange(mh, dtype=jnp.float32) + 0.5) / mh * (y2 - y1)
        xs = x1 + (jnp.arange(mw, dtype=jnp.float32) + 0.5) / mw * (x2 - x1)
        yi = jnp.clip(jnp.floor(ys).astype(jnp.int32), 0, h - 1)
        xi = jnp.clip(jnp.floor(xs).astype(jnp.int32), 0, w - 1)
        return mask[yi[:, None], xi[None, :]].astype(jnp.bfloat16)

    return jax.vmap(one)(seg_masks, boxes_yxyx)


class MaskRCNNLossComputation:
    """JAX/Pallas re-implementation of the PyTorch module's forward pass.

    proposals: list (per image) of dicts {"boxes": (P,4) zyxzyx=(y1,x1,y2,x2),
                                          "matched_idxs": (P,) int}
    targets:   list (per image) of dicts {"labels": (G,) int, "masks": (G,H,W)}
    mask_logits: (sum_P, num_classes, M, M)
    """

    def __init__(self, discretization_size):
        self.discretization_size = tuple(discretization_size)

    def _prepare_targets(self, proposals, targets):
        labels, masks = [], []
        for prop, tgt in zip(proposals, targets):
            # Matches the given spec: clamp(min=0) then gather labels.
            # TODO(synk): the spec does not zero labels for matched_idxs < 0
            # (unlike upstream maskrcnn-benchmark); we keep the spec semantics.
            matched_idxs = jnp.maximum(prop["matched_idxs"], 0)
            labels_per_image = tgt["labels"][matched_idxs].astype(jnp.int32)
            positive_idx = jnp.nonzero(labels_per_image > 0)[0]
            seg_masks = tgt["masks"][matched_idxs][positive_idx]
            pos_boxes = prop["boxes"][positive_idx]
            masks_per_image = _project_masks_on_boxes(
                seg_masks, pos_boxes, self.discretization_size)
            labels.append(labels_per_image)
            masks.append(masks_per_image)
        return labels, masks

    def __call__(self, proposals, mask_logits, targets):
        # TODO(synk): jnp.nonzero / Python-int shapes keep this glue eager-only
        # (mirrors the data-dependent control flow of the PyTorch reference);
        # the Pallas hot path is bucketed to static shapes so it compiles once
        # per (power-of-two bucket, M) rather than once per positive count.
        labels, mask_targets = self._prepare_targets(proposals, targets)
        labels = jnp.concatenate(labels, axis=0)
        total_pos = sum(int(m.shape[0]) for m in mask_targets)
        if total_pos == 0:
            return jnp.sum(mask_logits) * 0.0      # matches `mask_logits.sum() * 0`
        mask_targets = jnp.concatenate(mask_targets, axis=0)
        pos_idx = jnp.nonzero(labels > 0)[0].astype(jnp.int32)
        pos_labels = labels[pos_idx]
        # class-channel gather in the wrapper: touches only num_pos * M*M elems,
        # keeps the big (N, C, M, M) logits tensor in its native dtype in HBM.
        gathered = mask_logits[pos_idx, pos_labels]            # (num_pos, M, M)
        return mask_loss_pallas(gathered, mask_targets)


# --------------------------------- demo -------------------------------------- #

if __name__ == "__main__":
    key = jax.random.PRNGKey(0)
    num_images = 2
    num_proposals = 6
    num_gt = 3
    num_classes = 5
    H = W = 32
    M = (16, 16)

    keys = jax.random.split(key, 16)
    proposals, targets = [], []
    for img in range(num_images):
        k = jax.random.split(keys[img], 5)
        y1 = jax.random.uniform(k[0], (num_proposals,), minval=0.0, maxval=H / 2)
        x1 = jax.random.uniform(k[1], (num_proposals,), minval=0.0, maxval=W / 2)
        hh = jax.random.uniform(k[2], (num_proposals,), minval=4.0, maxval=H / 2)
        ww = jax.random.uniform(k[3], (num_proposals,), minval=4.0, maxval=W / 2)
        boxes = jnp.stack(
            [y1, x1, jnp.minimum(y1 + hh, H - 1.0), jnp.minimum(x1 + ww, W - 1.0)],
            axis=-1)
        matched_idxs = jax.random.randint(k[4], (num_proposals,), -1, num_gt)
        matched_idxs = matched_idxs.at[0].set(0)   # guarantee a match to gt 0
        proposals.append({"boxes": boxes, "matched_idxs": matched_idxs})

        kt = jax.random.split(keys[4 + img], 2)
        gt_labels = jax.random.randint(kt[0], (num_gt,), 0, num_classes)
        gt_labels = gt_labels.at[0].set(1)         # gt 0 is a positive class
        gt_masks = (jax.random.uniform(kt[1], (num_gt, H, W)) > 0.5).astype(
            jnp.float32)
        targets.append({"labels": gt_labels, "masks": gt_masks})

    mask_logits = jax.random.normal(
        keys[10], (num_images * num_proposals, num_classes, M[0], M[1]),
        dtype=jnp.float32)

    loss_module = MaskRCNNLossComputation(M)
    loss = jax.block_until_ready(loss_module(proposals, mask_logits, targets))

    # pure-JAX reference of the hot path for a sanity check
    labels_ref, mask_tgt_ref = loss_module._prepare_targets(proposals, targets)
    labels_ref = jnp.concatenate(labels_ref, 0)
    mask_tgt_ref = jnp.concatenate(mask_tgt_ref, 0).astype(jnp.float32)
    pos_ref = jnp.nonzero(labels_ref > 0)[0]
    sel = mask_logits[pos_ref, labels_ref[pos_ref]].astype(jnp.float32)
    ref = jnp.mean(jnp.maximum(sel, 0.0) - sel * mask_tgt_ref
                   + jnp.log1p(jnp.exp(-jnp.abs(sel))))
    assert jnp.allclose(loss, ref, rtol=1e-5, atol=1e-5), (float(loss), float(ref))

    print("KERNEL_OK")
</pallas_src>

<mosaic_0001>
module attributes {stable_mosaic.version = 11 : i64} {
  func.func @_mask_bce_kernel(%arg0: i32, %arg1: memref<128x256xf32, #tpu.memory_space<vmem>>, %arg2: memref<128x256xbf16, #tpu.memory_space<vmem>>, %arg3: memref<32x256xf32, #tpu.memory_space<vmem>>) attributes {dimension_semantics = [#tpu.dimension_semantics<parallel>], iteration_bounds = array<i64: 1>, scalar_prefetch = 0 : i64, scratch_operands = 0 : i64, tpu.core_type = #tpu.core_type<tc>, window_params = [{transform_indices = @transform_0, window_bounds = array<i64: 128, 256>}, {transform_indices = @transform_1, window_bounds = array<i64: 128, 256>}, {transform_indices = @transform_2, window_bounds = array<i64: 32, 256>}]} {
    %cst = arith.constant 0.000000e+00 : f32
    %0 = vector.broadcast %cst : f32 to vector<32x256xf32>
    %c0_i32 = arith.constant 0 : i32
    %c32_i32 = arith.constant 32 : i32
    %1 = arith.muli %c0_i32, %c32_i32 : i32
    %2 = tpu.assume_multiple %1, 32 : i32
    %3 = arith.index_cast %2 : i32 to index
    %c0 = arith.constant 0 : index
    %4 = vector.load %arg1[%3, %c0] : memref<128x256xf32, #tpu.memory_space<vmem>>, vector<32x256xf32>
    %5 = arith.index_cast %2 : i32 to index
    %c0_0 = arith.constant 0 : index
    %6 = vector.load %arg2[%5, %c0_0] : memref<128x256xbf16, #tpu.memory_space<vmem>>, vector<32x256xbf16>
    %7 = arith.extf %6 : vector<32x256xbf16> to vector<32x256xf32>
    %cst_1 = arith.constant 0.000000e+00 : f32
    %8 = vector.broadcast %cst_1 : f32 to vector<32x256xf32>
    %9 = arith.maximumf %4, %8 : vector<32x256xf32>
    %10 = arith.mulf %4, %7 : vector<32x256xf32>
    %11 = arith.subf %9, %10 : vector<32x256xf32>
    %12 = math.absf %4 : vector<32x256xf32>
    %cst_2 = arith.constant 0.000000e+00 : f32
    %13 = vector.broadcast %cst_2 : f32 to vector<32x256xf32>
    %14 = arith.subf %13, %12 : vector<32x256xf32>
    %15 = math.exp %14 : vector<32x256xf32>
    %16 = math.log1p %15 : vector<32x256xf32>
    %17 = arith.addf %11, %16 : vector<32x256xf32>
    %18 = arith.addf %0, %17 : vector<32x256xf32>
    %c1_i32 = arith.constant 1 : i32
    %c32_i32_3 = arith.constant 32 : i32
    %19 = arith.muli %c1_i32, %c32_i32_3 : i32
    %20 = tpu.assume_multiple %19, 32 : i32
    %21 = arith.index_cast %20 : i32 to index
    %c0_4 = arith.constant 0 : index
    %22 = vector.load %arg1[%21, %c0_4] : memref<128x256xf32, #tpu.memory_space<vmem>>, vector<32x256xf32>
    %23 = arith.index_cast %20 : i32 to index
    %c0_5 = arith.constant 0 : index
    %24 = vector.load %arg2[%23, %c0_5] : memref<128x256xbf16, #tpu.memory_space<vmem>>, vector<32x256xbf16>
    %25 = arith.extf %24 : vector<32x256xbf16> to vector<32x256xf32>
    %cst_6 = arith.constant 0.000000e+00 : f32
    %26 = vector.broadcast %cst_6 : f32 to vector<32x256xf32>
    %27 = arith.maximumf %22, %26 : vector<32x256xf32>
    %28 = arith.mulf %22, %25 : vector<32x256xf32>
    %29 = arith.subf %27, %28 : vector<32x256xf32>
    %30 = math.absf %22 : vector<32x256xf32>
    %cst_7 = arith.constant 0.000000e+00 : f32
    %31 = vector.broadcast %cst_7 : f32 to vector<32x256xf32>
    %32 = arith.subf %31, %30 : vector<32x256xf32>
    %33 = math.exp %32 : vector<32x256xf32>
    %34 = math.log1p %33 : vector<32x256xf32>
    %35 = arith.addf %29, %34 : vector<32x256xf32>
    %36 = arith.addf %18, %35 : vector<32x256xf32>
    %c2_i32 = arith.constant 2 : i32
    %c32_i32_8 = arith.constant 32 : i32
    %37 = arith.muli %c2_i32, %c32_i32_8 : i32
    %38 = tpu.assume_multiple %37, 32 : i32
    %39 = arith.index_cast %38 : i32 to index
    %c0_9 = arith.constant 0 : index
    %40 = vector.load %arg1[%39, %c0_9] : memref<128x256xf32, #tpu.memory_space<vmem>>, vector<32x256xf32>
    %41 = arith.index_cast %38 : i32 to index
    %c0_10 = arith.constant 0 : index
    %42 = vector.load %arg2[%41, %c0_10] : memref<128x256xbf16, #tpu.memory_space<vmem>>, vector<32x256xbf16>
    %43 = arith.extf %42 : vector<32x256xbf16> to vector<32x256xf32>
    %cst_11 = arith.constant 0.000000e+00 : f32
    %44 = vector.broadcast %cst_11 : f32 to vector<32x256xf32>
    %45 = arith.maximumf %40, %44 : vector<32x256xf32>
    %46 = arith.mulf %40, %43 : vector<32x256xf32>
    %47 = arith.subf %45, %46 : vector<32x256xf32>
    %48 = math.absf %40 : vector<32x256xf32>
    %cst_12 = arith.constant 0.000000e+00 : f32
    %49 = vector.broadcast %cst_12 : f32 to vector<32x256xf32>
    %50 = arith.subf %49, %48 : vector<32x256xf32>
    %51 = math.exp %50 : vector<32x256xf32>
    %52 = math.log1p %51 : vector<32x256xf32>
    %53 = arith.addf %47, %52 : vector<32x256xf32>
    %54 = arith.addf %36, %53 : vector<32x256xf32>
    %c3_i32 = arith.constant 3 : i32
    %c32_i32_13 = arith.constant 32 : i32
    %55 = arith.muli %c3_i32, %c32_i32_13 : i32
    %56 = tpu.assume_multiple %55, 32 : i32
    %57 = arith.index_cast %56 : i32 to index
    %c0_14 = arith.constant 0 : index
    %58 = vector.load %arg1[%57, %c0_14] : memref<128x256xf32, #tpu.memory_space<vmem>>, vector<32x256xf32>
    %59 = arith.index_cast %56 : i32 to index
    %c0_15 = arith.constant 0 : index
    %60 = vector.load %arg2[%59, %c0_15] : memref<128x256xbf16, #tpu.memory_space<vmem>>, vector<32x256xbf16>
    %61 = arith.extf %60 : vector<32x256xbf16> to vector<32x256xf32>
    %cst_16 = arith.constant 0.000000e+00 : f32
    %62 = vector.broadcast %cst_16 : f32 to vector<32x256xf32>
    %63 = arith.maximumf %58, %62 : vector<32x256xf32>
    %64 = arith.mulf %58, %61 : vector<32x256xf32>
    %65 = arith.subf %63, %64 : vector<32x256xf32>
    %66 = math.absf %58 : vector<32x256xf32>
    %cst_17 = arith.constant 0.000000e+00 : f32
    %67 = vector.broadcast %cst_17 : f32 to vector<32x256xf32>
    %68 = arith.subf %67, %66 : vector<32x256xf32>
    %69 = math.exp %68 : vector<32x256xf32>
    %70 = math.log1p %69 : vector<32x256xf32>
    %71 = arith.addf %65, %70 : vector<32x256xf32>
    %72 = arith.addf %54, %71 : vector<32x256xf32>
    %c4_i32 = arith.constant 4 : i32
    %c0_18 = arith.constant 0 : index
    %c0_19 = arith.constant 0 : index
    %73 = vector.load %arg3[%c0_18, %c0_19] : memref<32x256xf32, #tpu.memory_space<vmem>>, vector<32x256xf32>
    tpu.vector_store %arg3[%c0_18, %c0_19], %72 {strides = array<i32>} : memref<32x256xf32, #tpu.memory_space<vmem>>, vector<32x256xf32>,
    return
  }
  func.func @transform_0(%arg0: i32) -> (i32, i32) {
    %c0_i32 = arith.constant 0 : i32
    %c0_i32_0 = arith.constant 0 : i32
    return %arg0, %c0_i32 : i32, i32
  }
  func.func @transform_1(%arg0: i32) -> (i32, i32) {
    %c0_i32 = arith.constant 0 : i32
    %c0_i32_0 = arith.constant 0 : i32
    return %arg0, %c0_i32 : i32, i32
  }
  func.func @transform_2(%arg0: i32) -> (i32, i32) {
    %c0_i32 = arith.constant 0 : i32
    %c0_i32_0 = arith.constant 0 : i32
    return %arg0, %c0_i32 : i32, i32
  }
}

</mosaic_0001>

<bundles_post_ra>
// kernel: tpu_custom_call.1
= control target key start
LH: loop header
LB: loop body
LE: loop exit
PB: predicated region body
PF: predicated region fallthrough
CT: control target
= control target key end

     0   :  { %7 = vsyncpa [#allocation3], 0  ;;  %s1788_s0 = inlined_call_operand.hbm [shape: f32[128,256], index: 0, kind: input, shape index: {}]   ;;  %s1789_s1 = inlined_call_operand.hbm [shape: bf16[128,256], index: 1, kind: input, shape index: {}]   ;;  %s1790_s2 = inlined_call_operand.hbm [shape: f32[32,256], index: 2, kind: output, shape index: {}]  }
   0x1   :  { %8 = vsyncpa [#allocation6], 0 }
   0x2   :  { %9 = vsyncpa [#allocation4], 0  ;;  %s955_s9 = smov [#allocation2]   ;;  %s883_s13 = scalar_lea.hbm %s1788_s0, 4096 }
   0x3   :  { %s15_s10 = sshll.u32 %s955_s9, 4  ;;  %p884_p0 = scmp.ne.s32.totalorder %s1788_s0, %s883_s13  ;;  %s16_s10 = int_to_ptr.vmem [resolvable:$true] %s15_s10 }
   0x4   :  { %p887_p1 = scmp.lt.u32.totalorder %s883_s13, %s1788_s0 }
   0x6   :  { %p889_p2 = pnand %p887_p1, %p884_p0 }
   0x8   :  { %892 = shalt.err (!%p889_p2)
}
   0x9   :  { %s893_s18 = scalar_lea.vmem %s16_s10, 4096  ;;  %p898_p4 = scmp.lt.s32.totalorder %s16_s10, %s16_s10 }
   0xa   :  { %p894_p3 = scmp.ne.s32.totalorder %s16_s10, %s893_s18  ;;  %p899_p5 = scmp.lt.s32.totalorder %s893_s18, %s893_s18 }
   0xc   :  { %p900_p6 = por %p899_p5, %p898_p4 }
   0xe   :  { %p901_p7 = pnand %p900_p6, %p894_p3 }
  0x10   :  { %904 = shalt.err (!%p901_p7)
}
  0x11   :  { %s956_s19 = smov 256   ;;  %s957_s20 = smov 16  }
  0x12   :  { %21 = dma.hbm_to_vmem [thread:$0]  %s1788_s0, 4096, %s16_s10, [#allocation3], %s956_s19, %s956_s19, %s957_s20  }
  0x13   :  { %s958_s23 = smov [#allocation5]   ;;  %s905_s27 = scalar_lea.hbm %s1789_s1, 2048 }
  0x14   :  { %s27_s24 = sshll.u32 %s958_s23, 4  ;;  %p906_p8 = scmp.ne.s32.totalorder %s1789_s1, %s905_s27  ;;  %s28_s24 = int_to_ptr.vmem [resolvable:$true] %s27_s24 }
  0x15   :  { %p909_p9 = scmp.lt.u32.totalorder %s905_s27, %s1789_s1 }
  0x17   :  { %p911_p10 = pnand %p909_p9, %p906_p8 }
  0x19   :  { %914 = shalt.err (!%p911_p10)
}
  0x1a   :  { %s915_s4 = scalar_lea.vmem %s28_s24, 2048  ;;  %p920_p12 = scmp.lt.s32.totalorder %s28_s24, %s28_s24 }
  0x1b   :  { %p916_p11 = scmp.ne.s32.totalorder %s28_s24, %s915_s4  ;;  %p921_p13 = scmp.lt.s32.totalorder %s915_s4, %s915_s4 }
  0x1d   :  { %p922_p0 = por %p921_p13, %p920_p12 }
  0x1f   :  { %p923_p1 = pnand %p922_p0, %p916_p11 }
  0x21   :  { %926 = shalt.err (!%p923_p1)
}
  0x22   :  { %s959_s0 = smov 128   ;;  %s960_s5 = smov 8  }
  0x23   :  { %33 = dma.hbm_to_vmem [thread:$0]  %s1789_s1, 2048, %s28_s24, [#allocation6], %s959_s0, %s959_s0, %s960_s5  }
  0x24   :  { %949 = dma.done.wait [#allocation3], 4096  }
  0x25   :  { %950 = vsyncadd [#allocation3], 4294963200 }
  0x26   :  { %951 = dma.done.wait [#allocation6], 2048  }
  0x27   :  { %952 = vsyncadd [#allocation6], 4294965248  ;;  %v1004_v0 = vld [vmem:[#allocation2] sm:$0xff]  ;;  %v1006_v1 = vld [vmem:[#allocation2 + $0x8] sm:$0xff]  ;;  %s961_s1 = smov [#allocation7]  }
  0x28   :  { %v1008_v2 = vld [vmem:[#allocation2 + $0x10] sm:$0xff]  ;;  %v1010_v3 = vld [vmem:[#allocation2 + $0x18] sm:$0xff]  ;;  %v89_v4 = vand.u32 2147483647, %v1004_v0  ;;  %v1013_v5 = vld [vmem:[#allocation2 + $0x20] sm:$0xff]  ;;  %v65_v20 = vmax.f32 %v1004_v0, 0.0 }
  0x29   :  { %v90_v6 = vand.u32 2147483647, %v1006_v1  ;;  %v1016_v7 = vld [vmem:[#allocation2 + $0x28] sm:$0xff]  ;;  %v91_v8 = vand.u32 2147483647, %v1008_v2  ;;  %v1019_v9 = vld [vmem:[#allocation2 + $0x30] sm:$0xff] }
  0x2a   :  { %v92_v10 = vand.u32 2147483647, %v1010_v3  ;;  %v93_v11 = vand.u32 2147483647, %v1013_v5  ;;  %v97_v12 = vsub.f32 0.0, %v89_v4  ;;  %v1023_v13 = vld [vmem:[#allocation2 + $0x38] sm:$0xff] }
  0x2b   :  { %v94_v14 = vand.u32 2147483647, %v1016_v7  ;;  %v98_v15 = vsub.f32 0.0, %v90_v6  ;;  %v95_v16 = vand.u32 2147483647, %v1019_v9  ;;  %v99_v17 = vsub.f32 0.0, %v91_v8 }
  0x2c   :  { %v53_v18 = vld [vmem:[#allocation5] sm:$0xff]  ;;  %v54_v19 = vld [vmem:[#allocation5 + $0x8] sm:$0xff]  ;;  %v66_v21 = vmax.f32 %v1006_v1, 0.0  ;;  %v67_v22 = vmax.f32 %v1008_v2, 0.0  ;;  %v100_v23 = vsub.f32 0.0, %v92_v10  ;;  %v55_v24 = vld [vmem:[#allocation5 + $0x10] sm:$0xff] }
  0x2d   :  { %v96_v25 = vand.u32 2147483647, %v1023_v13  ;;  %v101_v26 = vsub.f32 0.0, %v93_v11  ;;  %v105_v27 = vmul.f32 1.442695, %v97_v12  ;;  %v68_v28 = vmax.f32 %v1010_v3, 0.0 }
  0x2e   :  { %v69_v29 = vmax.f32 %v1013_v5, 0.0  ;;  %v102_v30 = vsub.f32 0.0, %v94_v14  ;;  %v107_v31 = vmul.f32 1.442695, %v98_v15  ;;  %v56_v32 = vld [vmem:[#allocation5 + $0x18] sm:$0xff]  ;;  %v57_v33 = vunpack.c.l.bf16 %v53_v18  ;;  %v222_v56 = vld [vmem:[#allocation5 + $0x20] sm:$0xff] }
  0x2f   :  { %v58_v34 = vunpack.c.h.bf16 %v53_v18  ;;  %v103_v35 = vsub.f32 0.0, %v95_v16  ;;  %v109_v36 = vmul.f32 1.442695, %v99_v17  ;;  %v59_v37 = vunpack.c.l.bf16 %v54_v19  ;;  %v223_v60 = vld [vmem:[#allocation5 + $0x28] sm:$0xff]  ;;  %v224_v61 = vld [vmem:[#allocation5 + $0x30] sm:$0xff]  ;;  %v1058_v12 = vld [vmem:[#allocation2 + $0x40] sm:$0xff] }
  0x30   :  { %v60_v38 = vunpack.c.h.bf16 %v54_v19  ;;  %v61_v39 = vunpack.c.l.bf16 %v55_v24  ;;  %v111_v40 = vmul.f32 1.442695, %v100_v23  ;;  %v62_v41 = vunpack.c.h.bf16 %v55_v24  ;;  %v1064_v16 = vld [vmem:[#allocation2 + $0x50] sm:$0xff]  ;;  %v1066_v17 = vld [vmem:[#allocation2 + $0x58] sm:$0xff]  ;;  %v1072_v23 = vld [vmem:[#allocation2 + $0x60] sm:$0xff]  ;;  %s729_s8 = sshll.u32 %s961_s1, 4  ;;  %s730_s8 = int_to_ptr.vmem [resolvable:$true] %s729_s8 }
  0x31   :  { %v104_v42 = vsub.f32 0.0, %v96_v25  ;;  %755 = vpow2.f32 %v105_v27  ;;  %v113_v43 = vmul.f32 1.442695, %v101_v26  ;;  %v63_v44 = vunpack.c.l.bf16 %v56_v32  ;;  %s927_s9 = scalar_lea.vmem %s730_s8, 1024  ;;  %p932_p3 = scmp.lt.s32.totalorder %s730_s8, %s730_s8 }
  0x32   :  { %v64_v45 = vunpack.c.h.bf16 %v56_v32  ;;  %757 = vpow2.f32 %v107_v31  ;;  %v115_v46 = vmul.f32 1.442695, %v102_v30  ;;  %v73_v47 = vmul.f32 %v57_v33, %v1004_v0  ;;  %p928_p2 = scmp.ne.s32.totalorder %s730_s8, %s927_s9  ;;  %p933_p4 = scmp.lt.s32.totalorder %s927_s9, %s927_s9 }
  0x33   :  { %v74_v48 = vmul.f32 %v58_v34, %v1006_v1  ;;  %759 = vpow2.f32 %v109_v36  ;;  %v117_v49 = vmul.f32 1.442695, %v103_v35  ;;  %v70_v50 = vmax.f32 %v1016_v7, 0.0 }
  0x34   :  { %v75_v51 = vmul.f32 %v59_v37, %v1008_v2  ;;  %v76_v52 = vmul.f32 %v60_v38, %v1010_v3  ;;  %761 = vpow2.f32 %v111_v40  ;;  %v71_v53 = vmax.f32 %v1019_v9, 0.0  ;;  %v225_v3 = vld [vmem:[#allocation5 + $0x38] sm:$0xff]  ;;  %v1091_v37 = vld [vmem:[#allocation2 + $0x70] sm:$0xff]  ;;  %p934_p5 = por %p933_p4, %p932_p3 }
  0x35   :  { %v72_v54 = vmax.f32 %v1023_v13, 0.0  ;;  %763 = vpow2.f32 %v113_v43  ;;  %v119_v55 = vmul.f32 1.442695, %v104_v42  ;;  %v77_v57 = vmul.f32 %v61_v39, %v1013_v5  ;;  %v1093_v38 = vld [vmem:[#allocation2 + $0x78] sm:$0xff] }
  0x36   :  { %v78_v58 = vmul.f32 %v62_v41, %v1016_v7  ;;  %v79_v59 = vmul.f32 %v63_v44, %v1019_v9  ;;  %765 = vpow2.f32 %v115_v46  ;;  %v80_v62 = vmul.f32 %v64_v45, %v1023_v13  ;;  %v1060_v13 = vld [vmem:[#allocation2 + $0x48] sm:$0xff]  ;;  %p935_p6 = pnand %p934_p5, %p928_p2 }
  0x37   :  { %v1044_v63 = vsub.f32 %v65_v20, %v73_v47  ;;  %v1046_v0 = vsub.f32 %v66_v21, %v74_v48  ;;  %767 = vpow2.f32 %v117_v49  ;;  %v1048_v1 = vsub.f32 %v67_v22, %v75_v51 }
  0x38   :  { %v1050_v2 = vsub.f32 %v68_v28, %v76_v52  ;;  %v226_v4 = vunpack.c.l.bf16 %v222_v56  ;;  %v227_v5 = vunpack.c.h.bf16 %v222_v56  ;;  %769 = vpow2.f32 %v119_v55 }
  0x39   :  { %v228_v6 = vunpack.c.l.bf16 %v223_v60  ;;  %v229_v7 = vunpack.c.h.bf16 %v223_v60  ;;  %v230_v8 = vunpack.c.l.bf16 %v224_v61  ;;  %v1052_v9 = vsub.f32 %v69_v29, %v77_v57  ;;  %v1080_v29 = vld [vmem:[#allocation2 + $0x68] sm:$0xff] }
  0x3a   :  { %v1054_v10 = vsub.f32 %v70_v50, %v78_v58  ;;  %v1056_v11 = vsub.f32 %v71_v53, %v79_v59  ;;  %v231_v14 = vunpack.c.h.bf16 %v224_v61  ;;  %v232_v18 = vunpack.c.l.bf16 %v225_v3 }
  0x3b   :  { %v1062_v15 = vpop.eup %755  ;;  %v233_v19 = vunpack.c.h.bf16 %v225_v3  ;;  %v234_v20 = vmax.f32 %v1058_v12, 0.0  ;;  %v235_v21 = vmax.f32 %v1060_v13, 0.0  ;;  %v236_v24 = vmax.f32 %v1064_v16, 0.0 }
  0x3c   :  { %v1070_v22 = vpop.eup %757  ;;  %v237_v25 = vmax.f32 %v1066_v17, 0.0  ;;  %v242_v26 = vmul.f32 %v226_v4, %v1058_v12  ;;  %v243_v27 = vmul.f32 %v227_v5, %v1060_v13  ;;  %v238_v30 = vmax.f32 %v1072_v23, 0.0 }
  0x3d   :  { %v1078_v28 = vpop.eup %759  ;;  %v244_v31 = vmul.f32 %v228_v6, %v1064_v16  ;;  %v245_v32 = vmul.f32 %v229_v7, %v1066_v17  ;;  %v246_v33 = vmul.f32 %v230_v8, %v1072_v23  ;;  %v1088_v35 = vsub.f32 %v72_v54, %v80_v62 }
  0x3e   :  { %v1086_v34 = vpop.eup %761  ;;  %v121_v36 = vadd.f32 1.0, %v1062_v15  ;;  %v239_v39 = vmax.f32 %v1080_v29, 0.0  ;;  %v247_v40 = vmul.f32 %v231_v14, %v1080_v29  ;;  %v130_v42 = vadd.f32 1.0, %v1070_v22 }
  0x3f   :  { %v1097_v41 = vpop.eup %763  ;;  %v1103_v45 = vmul.f32 %v232_v18, %v1091_v37  ;;  %v139_v47 = vadd.f32 1.0, %v1078_v28  ;;  %v1109_v48 = vmul.f32 %v233_v19, %v1093_v38  ;;  %v1111_v49 = vsub.f32 %v234_v20, %v242_v26 }
  0x40   :  { %v1105_v46 = vpop.eup %765  ;;  %v1113_v50 = vsub.f32 %v235_v21, %v243_v27  ;;  %v148_v52 = vadd.f32 1.0, %v1086_v34  ;;  %v1118_v53 = vsub.f32 %v236_v24, %v244_v31  ;;  %v1120_v54 = vsub.f32 %v237_v25, %v245_v32 }
  0x41   :  { %v1115_v51 = vpop.eup %767  ;;  %v1122_v55 = vsub.f32 %v238_v30, %v246_v33  ;;  %771 = vlog2.f32 %v121_v36  ;;  %v157_v56 = vadd.f32 1.0, %v1097_v41  ;;  %v1125_v57 = vsub.f32 %v239_v39, %v247_v40 }
  0x42   :  { %v258_v58 = vand.u32 2147483647, %v1058_v12  ;;  %v1128_v59 = vpop.eup %769  ;;  %v124_v60 = vmul.f32 -0.5, %v1062_v15  ;;  %773 = vlog2.f32 %v130_v42  ;;  %v166_v61 = vadd.f32 1.0, %v1105_v46 }
  0x43   :  { %1792 = vst [vmem:[#allocation11_spill] sm:$0xff] %v1125_v57  ;;  %v259_v62 = vand.u32 2147483647, %v1060_v13  ;;  %v133_v3 = vmul.f32 -0.5, %v1070_v22  ;;  %775 = vlog2.f32 %v139_v47  ;;  %v175_v4 = vadd.f32 1.0, %v1115_v51 }
  0x44   :  { %v260_v5 = vand.u32 2147483647, %v1064_v16  ;;  %v142_v6 = vmul.f32 -0.5, %v1078_v28  ;;  %777 = vlog2.f32 %v148_v52  ;;  %v261_v7 = vand.u32 2147483647, %v1066_v17 }
  0x45   :  { %v262_v8 = vand.u32 2147483647, %v1072_v23  ;;  %v127_v12 = vand.u32 2147483647, %v1062_v15  ;;  %v151_v14 = vmul.f32 -0.5, %v1086_v34  ;;  %779 = vlog2.f32 %v157_v56 }
  0x46   :  { %v184_v13 = vadd.f32 1.0, %v1128_v59  ;;  %v125_v18 = vadd.f32 1.0, %v124_v60  ;;  %v160_v19 = vmul.f32 -0.5, %v1097_v41  ;;  %781 = vlog2.f32 %v166_v61 }
  0x47   :  { %v263_v16 = vand.u32 2147483647, %v1080_v29  ;;  %v134_v20 = vadd.f32 1.0, %v133_v3  ;;  %v136_v21 = vand.u32 2147483647, %v1070_v22  ;;  %783 = vlog2.f32 %v175_v4 }
  0x48   :  { %v266_v17 = vsub.f32 0.0, %v258_v58  ;;  %v143_v24 = vadd.f32 1.0, %v142_v6  ;;  %v145_v23 = vand.u32 2147483647, %v1078_v28  ;;  %v154_v25 = vand.u32 2147483647, %v1086_v34 }
  0x49   :  { %v169_v26 = vmul.f32 -0.5, %v1105_v46  ;;  %v152_v27 = vadd.f32 1.0, %v151_v14  ;;  %v163_v30 = vand.u32 2147483647, %v1097_v41  ;;  %785 = vlog2.f32 %v184_v13 }
  0x4a   :  { %v267_v31 = vsub.f32 0.0, %v259_v62  ;;  %v1150_v32 = vmul.f32 %v1062_v15, %v125_v18  ;;  %v161_v29 = vadd.f32 1.0, %v160_v19  ;;  %v264_v33 = vand.u32 2147483647, %v1091_v37 }
  0x4b   :  { %v268_v36 = vsub.f32 0.0, %v260_v5  ;;  %v772_v39 = vpop.eup %771  ;;  %vm1153_vm0 = vcmp.lt.f32.partialorder %v127_v12, 0.0004427343  ;;  %v1158_v42 = vmul.f32 %v1070_v22, %v134_v20  ;;  %v172_v47 = vand.u32 2147483647, %v1105_v46 }
  0x4c   :  { %v178_v52 = vmul.f32 -0.5, %v1115_v51  ;;  %v274_v56 = vmul.f32 1.442695, %v266_v17  ;;  %v774_v58 = vpop.eup %773  ;;  %vm1162_vm1 = vcmp.lt.f32.partialorder %v136_v21, 0.0004427343  ;;  %v1167_v60 = vmul.f32 %v1078_v28, %v143_v24 }
  0x4d   :  { %vm1169_vm2 = vcmp.lt.f32.partialorder %v145_v23, 0.0004427343  ;;  %vm1173_vm3 = vcmp.lt.f32.partialorder %v154_v25, 0.0004427343  ;;  %v170_v62 = vadd.f32 1.0, %v169_v26  ;;  %v269_v3 = vsub.f32 0.0, %v261_v7  ;;  %v776_v4 = vpop.eup %775 }
  0x4e   :  { %v1178_v5 = vmul.f32 %v1086_v34, %v152_v27  ;;  %vm1180_vm4 = vcmp.lt.f32.partialorder %v163_v30, 0.0004427343  ;;  %v270_v28 = vsub.f32 0.0, %v262_v8  ;;  %v276_v12 = vmul.f32 1.442695, %v267_v31  ;;  %v778_v14 = vpop.eup %777 }
  0x4f   :  { %v1185_v13 = vmul.f32 %v1097_v41, %v161_v29  ;;  %v187_v18 = vmul.f32 -0.5, %v1128_v59  ;;  %v271_v19 = vsub.f32 0.0, %v263_v16  ;;  %v278_v20 = vmul.f32 1.442695, %v268_v36  ;;  %v780_v21 = vpop.eup %779 }
  0x50   :  { %vm1188_vm5 = vcmp.lt.f32.partialorder %v172_v47, 0.0004427343  ;;  %v179_v34 = vadd.f32 1.0, %v178_v52  ;;  %v265_v17 = vand.u32 2147483647, %v1093_v38  ;;  %787 = vpow2.f32 %v274_v56  ;;  %v782_v24 = vpop.eup %781 }
  0x51   :  { %v171_v8 = vmul.f32 %v1105_v46, %v170_v62  ;;  %v181_v23 = vand.u32 2147483647, %v1115_v51  ;;  %v190_v41 = vand.u32 2147483647, %v1128_v59  ;;  %v280_v25 = vmul.f32 1.442695, %v269_v3  ;;  %v784_v26 = vpop.eup %783 }
  0x52   :  { %v123_v16 = vmul.f32 0.6931472, %v772_v39  ;;  %v272_v27 = vsub.f32 0.0, %v264_v33  ;;  %789 = vpow2.f32 %v276_v12  ;;  %v282_v30 = vmul.f32 1.442695, %v270_v28  ;;  %v391_v28 = vld [vmem:[#allocation5 + $0x40] sm:$0xff] }
  0x53   :  { %v132_v31 = vmul.f32 0.6931472, %v774_v58  ;;  %v188_v29 = vadd.f32 1.0, %v187_v18  ;;  %791 = vpow2.f32 %v278_v20  ;;  %v284_v36 = vmul.f32 1.442695, %v271_v19  ;;  %v786_v47 = vpop.eup %785 }
  0x54   :  { %v141_v52 = vmul.f32 0.6931472, %v776_v4  ;;  %v150_v56 = vmul.f32 0.6931472, %v778_v14  ;;  %v180_v44 = vmul.f32 %v1115_v51, %v179_v34  ;;  %v273_v46 = vsub.f32 0.0, %v265_v17 }
  0x55   :  { %v159_v62 = vmul.f32 0.6931472, %v780_v21  ;;  %v168_v43 = vmul.f32 0.6931472, %v782_v24  ;;  %v177_v57 = vmul.f32 0.6931472, %v784_v26  ;;  %793 = vpow2.f32 %v280_v25 }
  0x56   :  { %vm1197_vm6 = vcmp.lt.f32.partialorder %v181_v23, 0.0004427343  ;;  %vm1201_vm7 = vcmp.lt.f32.partialorder %v190_v41, 0.0004427343  ;;  %795 = vpow2.f32 %v282_v30  ;;  %v286_v39 = vmul.f32 1.442695, %v272_v27 }
  0x57   :  { %v129_v58 = vsel %vm1153_vm0, %v1150_v32, %v123_v16  ;;  %v186_v51 = vmul.f32 0.6931472, %v786_v47  ;;  %v189_v4 = vmul.f32 %v1128_v59, %v188_v29  ;;  %797 = vpow2.f32 %v284_v36  ;;  %v1270_v24 = vld [vmem:[#allocation2 + $0x80] sm:$0xff]  ;;  %v1280_v26 = vld [vmem:[#allocation2 + $0x98] sm:$0xff]  ;;  %v1292_v47 = vld [vmem:[#allocation2 + $0xb0] sm:$0xff] }
  0x58   :  { %v138_v12 = vsel %vm1162_vm1, %v1158_v42, %v132_v31  ;;  %v147_v14 = vsel %vm1169_vm2, %v1167_v60, %v141_v52  ;;  %v156_v18 = vsel %vm1173_vm3, %v1178_v5, %v150_v56  ;;  %v288_v19 = vmul.f32 1.442695, %v273_v46  ;;  %v1282_v16 = vld [vmem:[#allocation2 + $0xa0] sm:$0xff]  ;;  %v1294_v52 = vld [vmem:[#allocation2 + $0xb8] sm:$0xff] }
  0x59   :  { %v165_v32 = vsel %vm1180_vm4, %v1185_v13, %v159_v62  ;;  %v174_v59 = vsel %vm1188_vm5, %v171_v8, %v168_v43  ;;  %v183_v40 = vsel %vm1197_vm6, %v180_v44, %v177_v57  ;;  %v1809_v42 = vmax.f32 %v1091_v37, 0.0  ;;  %v392_v43 = vld [vmem:[#allocation5 + $0x48] sm:$0xff]  ;;  %v393_v57 = vld [vmem:[#allocation5 + $0x50] sm:$0xff]  ;;  %v1251_v13 = vld [vmem:[#allocation5 + $0x58] sm:$0xff] }
  0x5a   :  { %v1230_v60 = vpop.eup %787  ;;  %v1233_v61 = vadd.f32 %v129_v58, %v1044_v63  ;;  %v1810_v22 = vmax.f32 %v1093_v38, 0.0  ;;  %799 = vpow2.f32 %v286_v39  ;;  %v395_v6 = vunpack.c.l.bf16 %v391_v28 }
  0x5b   :  { %v1228_v15 = vsub.f32 %v1809_v42, %v1103_v45  ;;  %v192_v44 = vsel %vm1201_vm7, %v189_v4, %v186_v51  ;;  %v1243_v37 = vadd.f32 %v138_v12, %v1046_v0  ;;  %v1246_v45 = vadd.f32 %v147_v14, %v1048_v1 }
  0x5c   :  { %v1238_v5 = vsub.f32 %v1810_v22, %v1109_v48  ;;  %v1249_v63 = vadd.f32 %v156_v18, %v1050_v2  ;;  %v1253_v38 = vpop.eup %789  ;;  %v1256_v48 = vadd.f32 %v165_v32, %v1052_v9  ;;  %v1259_v20 = vadd.f32 %v174_v59, %v1054_v10  ;;  %v1272_v9 = vld [vmem:[#allocation2 + $0x88] sm:$0xff]  ;;  %v1274_v10 = vld [vmem:[#allocation2 + $0x90] sm:$0xff] }
  0x5d   :  { %v1262_v0 = vadd.f32 %v183_v40, %v1056_v11  ;;  %801 = vpow2.f32 %v288_v19  ;;  %v1264_v1 = vpop.eup %791  ;;  %v290_v2 = vadd.f32 1.0, %v1230_v60  ;;  %v396_v21 = vunpack.c.h.bf16 %v391_v28 }
  0x5e   :  { %v397_v7 = vunpack.c.l.bf16 %v392_v43  ;;  %v398_v34 = vunpack.c.h.bf16 %v392_v43  ;;  %v1268_v17 = vadd.f32 %v192_v44, %v1088_v35  ;;  %v399_v8 = vunpack.c.l.bf16 %v393_v57  ;;  %v1284_v35 = vld [vmem:[#allocation2 + $0xa8] sm:$0xff] }
  0x5f   :  { %1811 = vst [vmem:[#allocation12_spill] sm:$0xff] %v1262_v0  ;;  %v400_v11 = vunpack.c.h.bf16 %v393_v57  ;;  %v401_v23 = vunpack.c.l.bf16 %v1251_v13  ;;  %v1277_v41 = vpop.eup %793  ;;  %v299_v25 = vadd.f32 1.0, %v1253_v38  ;;  %v402_v27 = vunpack.c.h.bf16 %v1251_v13 }
  0x60   :  { %1812 = vst [vmem:[#allocation13_spill] sm:$0xff] %v1268_v17  ;;  %v1289_v29 = vpop.eup %795  ;;  %v308_v36 = vadd.f32 1.0, %v1264_v1  ;;  %803 = vlog2.f32 %v290_v2  ;;  %v293_v51 = vmul.f32 -0.5, %v1230_v60  ;;  %v317_v4 = vadd.f32 1.0, %v1277_v41 }
  0x61   :  { %v1299_v3 = vpop.eup %797  ;;  %v1307_v28 = vmul.f32 %v395_v6, %v1270_v24  ;;  %v1310_v12 = vmul.f32 %v396_v21, %v1272_v9  ;;  %805 = vlog2.f32 %v299_v25  ;;  %v302_v14 = vmul.f32 -0.5, %v1253_v38 }
  0x62   :  { %v326_v18 = vadd.f32 1.0, %v1289_v29  ;;  %v1315_v19 = vmul.f32 %v397_v7, %v1274_v10  ;;  %807 = vlog2.f32 %v308_v36  ;;  %v335_v59 = vadd.f32 1.0, %v1299_v3 }
  0x63   :  { %v1321_v40 = vmul.f32 %v398_v34, %v1280_v26  ;;  %v1324_v42 = vmul.f32 %v399_v8, %v1282_v16  ;;  %v296_v22 = vand.u32 2147483647, %v1230_v60  ;;  %v311_v43 = vmul.f32 -0.5, %v1264_v1 }
  0x64   :  { %v1317_v32 = vpop.eup %799  ;;  %v1329_v6 = vmul.f32 %v400_v11, %v1284_v35  ;;  %v1332_v44 = vmul.f32 %v401_v23, %v1292_v47  ;;  %v294_v13 = vadd.f32 1.0, %v293_v51  ;;  %v305_v2 = vand.u32 2147483647, %v1253_v38 }
  0x65   :  { %809 = vlog2.f32 %v317_v4  ;;  %v320_v21 = vmul.f32 -0.5, %v1277_v41  ;;  %v303_v7 = vadd.f32 1.0, %v302_v14  ;;  %v329_v34 = vmul.f32 -0.5, %v1289_v29 }
  0x66   :  { %811 = vlog2.f32 %v326_v18  ;;  %v344_v8 = vadd.f32 1.0, %v1317_v32  ;;  %v314_v11 = vand.u32 2147483647, %v1264_v1  ;;  %v338_v23 = vmul.f32 -0.5, %v1299_v3 }
  0x67   :  { %v1334_v57 = vpop.eup %801  ;;  %813 = vlog2.f32 %v335_v59  ;;  %v1343_v25 = vmul.f32 %v402_v27, %v1294_v52  ;;  %vm1345_vm8 = vcmp.lt.f32.partialorder %v296_v22, 0.0004427343  ;;  %v312_v51 = vadd.f32 1.0, %v311_v43 }
  0x68   :  { %v323_v4 = vand.u32 2147483647, %v1277_v41  ;;  %v353_v14 = vadd.f32 1.0, %v1334_v57  ;;  %v295_v18 = vmul.f32 %v1230_v60, %v294_v13  ;;  %vm1352_vm9 = vcmp.lt.f32.partialorder %v305_v2, 0.0004427343 }
  0x69   :  { %v321_v59 = vadd.f32 1.0, %v320_v21  ;;  %v347_v39 = vmul.f32 -0.5, %v1317_v32  ;;  %v304_v22 = vmul.f32 %v1253_v38, %v303_v7  ;;  %v330_v33 = vadd.f32 1.0, %v329_v34 }
  0x6a   :  { %v804_v27 = vpop.eup %803  ;;  %v332_v62 = vand.u32 2147483647, %v1289_v29  ;;  %815 = vlog2.f32 %v344_v8  ;;  %vm1359_vm10 = vcmp.lt.f32.partialorder %v314_v11, 0.0004427343  ;;  %v339_v46 = vadd.f32 1.0, %v338_v23 }
  0x6b   :  { %v341_v60 = vand.u32 2147483647, %v1299_v3  ;;  %v356_v13 = vmul.f32 -0.5, %v1334_v57  ;;  %v806_v2 = vpop.eup %805  ;;  %v313_v21 = vmul.f32 %v1264_v1, %v312_v51  ;;  %vm1366_vm11 = vcmp.lt.f32.partialorder %v323_v4, 0.0004427343 }
  0x6c   :  { %v350_v38 = vand.u32 2147483647, %v1317_v32  ;;  %817 = vlog2.f32 %v353_v14  ;;  %v808_v7 = vpop.eup %807  ;;  %v292_v34 = vmul.f32 0.6931472, %v804_v27  ;;  %v1372_v8 = vmul.f32 %v1277_v41, %v321_v59 }
  0x6d   :  { %v348_v11 = vadd.f32 1.0, %v347_v39  ;;  %v427_v23 = vand.u32 2147483647, %v1270_v24  ;;  %v331_v31 = vmul.f32 %v1289_v29, %v330_v33  ;;  %vm1376_vm12 = vcmp.lt.f32.partialorder %v332_v62, 0.0004427343 }
  0x6e   :  { %v359_v1 = vand.u32 2147483647, %v1334_v57  ;;  %v428_v51 = vand.u32 2147483647, %v1272_v9  ;;  %v301_v14 = vmul.f32 0.6931472, %v806_v2  ;;  %v340_v27 = vmul.f32 %v1299_v3, %v339_v46 }
  0x6f   :  { %v810_v4 = vpop.eup %809  ;;  %vm1383_vm13 = vcmp.lt.f32.partialorder %v341_v60, 0.0004427343  ;;  %v357_v39 = vadd.f32 1.0, %v356_v13  ;;  %v310_v17 = vmul.f32 0.6931472, %v808_v7  ;;  %v1827_v62 = vmax.f32 %v1270_v24, 0.0 }
  0x70   :  { %v812_v59 = vpop.eup %811  ;;  %vm1387_vm14 = vcmp.lt.f32.partialorder %v350_v38, 0.0004427343  ;;  %v429_v2 = vand.u32 2147483647, %v1274_v10  ;;  %v298_v46 = vsel %vm1345_vm8, %v295_v18, %v292_v34  ;;  %v349_v3 = vmul.f32 %v1317_v32, %v348_v11 }
  0x71   :  { %v1394_v33 = vsub.f32 %v1827_v62, %v1307_v28  ;;  %v814_v0 = vpop.eup %813  ;;  %v430_v60 = vand.u32 2147483647, %v1280_v26  ;;  %v435_v13 = vsub.f32 0.0, %v427_v23  ;;  %vm1401_vm15 = vcmp.lt.f32.partialorder %v359_v1, 0.0004427343 }
  0x72   :  { %v1830_v24 = vmax.f32 %v1272_v9, 0.0  ;;  %v1831_v7 = vmax.f32 %v1274_v10, 0.0  ;;  %v431_v36 = vand.u32 2147483647, %v1282_v16  ;;  %v436_v32 = vsub.f32 0.0, %v428_v51 }
  0x73   :  { %v307_v18 = vsel %vm1352_vm9, %v304_v22, %v301_v14  ;;  %v319_v34 = vmul.f32 0.6931472, %v810_v4  ;;  %v328_v11 = vmul.f32 0.6931472, %v812_v59  ;;  %v358_v23 = vmul.f32 %v1334_v57, %v357_v39 }
  0x74   :  { %v1408_v28 = vsub.f32 %v1830_v24, %v1310_v12  ;;  %v1413_v62 = vsub.f32 %v1831_v7, %v1315_v19  ;;  %v816_v1 = vpop.eup %815  ;;  %v316_v9 = vsel %vm1359_vm10, %v313_v21, %v310_v17  ;;  %v337_v12 = vmul.f32 0.6931472, %v814_v0 }
  0x75   :  { %v432_v24 = vand.u32 2147483647, %v1284_v35  ;;  %v437_v10 = vsub.f32 0.0, %v429_v2  ;;  %v362_v19 = vadd.f32 %v298_v46, %v1111_v49  ;;  %v1832_v51 = vmax.f32 %v1280_v26, 0.0 }
  0x76   :  { %v438_v58 = vsub.f32 0.0, %v430_v60  ;;  %v443_v22 = vmul.f32 1.442695, %v435_v13  ;;  %v818_v4 = vpop.eup %817  ;;  %v363_v57 = vadd.f32 %v307_v18, %v1113_v50  ;;  %v433_v14 = vand.u32 2147483647, %v1292_v47 }
  0x77   :  { %v1426_v7 = vsub.f32 %v1832_v51, %v1321_v40  ;;  %v439_v43 = vsub.f32 0.0, %v431_v36  ;;  %v445_v17 = vmul.f32 1.442695, %v436_v32  ;;  %v325_v0 = vsel %vm1366_vm11, %v1372_v8, %v319_v34 }
  0x78   :  { %v346_v21 = vmul.f32 0.6931472, %v816_v1  ;;  %v364_v49 = vadd.f32 %v316_v9, %v1118_v53  ;;  %v1833_v26 = vmax.f32 %v1282_v16, 0.0  ;;  %v334_v39 = vsel %vm1376_vm12, %v331_v31, %v328_v11  ;;  %v562_v11 = vld [vmem:[#allocation5 + $0x70] sm:$0xff]  ;;  %v563_v1 = vld [vmem:[#allocation5 + $0x78] sm:$0xff] }
  0x79   :  { %v343_v50 = vsel %vm1383_vm13, %v340_v27, %v337_v12  ;;  %v440_v59 = vsub.f32 0.0, %v432_v24  ;;  %v447_v2 = vmul.f32 1.442695, %v437_v10  ;;  %v355_v46 = vmul.f32 0.6931472, %v818_v4  ;;  %v1834_v27 = vld [vmem:[#allocation11_spill] sm:$0xff] }
  0x7a   :  { %v1437_v40 = vsub.f32 %v1833_v26, %v1324_v42  ;;  %v434_v56 = vand.u32 2147483647, %v1294_v52  ;;  %819 = vpow2.f32 %v443_v22  ;;  %v449_v8 = vmul.f32 1.442695, %v438_v58  ;;  %v1497_v4 = vld [vmem:[#allocation2 + $0xd8] sm:$0xff] }
  0x7b   :  { %v1445_v53 = vadd.f32 %v362_v19, %v1233_v61  ;;  %v441_v60 = vsub.f32 0.0, %v433_v14  ;;  %821 = vpow2.f32 %v445_v17  ;;  %v451_v16 = vmul.f32 1.442695, %v439_v43  ;;  %v1838_v19 = vld [vmem:[#allocation12_spill] sm:$0xff] }
  0x7c   :  { %v352_v30 = vsel %vm1387_vm14, %v349_v3, %v346_v21  ;;  %v365_v31 = vadd.f32 %v325_v0, %v1120_v54  ;;  %v366_v42 = vadd.f32 %v334_v39, %v1122_v55  ;;  %v367_v41 = vadd.f32 %v343_v50, %v1834_v27  ;;  %v560_v3 = vld [vmem:[#allocation5 + $0x60] sm:$0xff]  ;;  %v1524_v27 = vld [vmem:[#allocation2 + $0xf8] sm:$0xff] }
  0x7d   :  { %v1835_v13 = vmax.f32 %v1284_v35, 0.0  ;;  %v1836_v61 = vmax.f32 %v1292_v47, 0.0  ;;  %823 = vpow2.f32 %v447_v2  ;;  %v453_v18 = vmul.f32 1.442695, %v440_v59  ;;  %v1510_v59 = vld [vmem:[#allocation2 + $0xe8] sm:$0xff]  ;;  %1841 = vst [vmem:[#allocation12_spill] sm:$0xff] %v1524_v27 }
  0x7e   :  { %v361_v29 = vsel %vm1401_vm15, %v358_v23, %v355_v46  ;;  %v1465_v54 = vadd.f32 %v363_v57, %v1243_v37  ;;  %v442_v55 = vsub.f32 0.0, %v434_v56  ;;  %825 = vpow2.f32 %v449_v8  ;;  %v1499_v57 = vld [vmem:[#allocation2 + $0xe0] sm:$0xff] }
  0x7f   :  { %v1455_v36 = vsub.f32 %v1835_v13, %v1329_v6  ;;  %v1460_v32 = vsub.f32 %v1836_v61, %v1332_v44  ;;  %v368_v35 = vadd.f32 %v352_v30, %v1228_v15  ;;  %v1837_v6 = vmax.f32 %v1294_v52, 0.0  ;;  %v561_v44 = vld [vmem:[#allocation5 + $0x68] sm:$0xff] }
  0x80   :  { %827 = vpow2.f32 %v451_v16  ;;  %v455_v47 = vmul.f32 1.442695, %v441_v60  ;;  %v1474_v38 = vadd.f32 %v364_v49, %v1246_v45  ;;  %v1477_v37 = vadd.f32 %v365_v31, %v1249_v63  ;;  %v1489_v63 = vld [vmem:[#allocation2 + $0xc0] sm:$0xff]  ;;  %v1839_v60 = vld [vmem:[#allocation13_spill] sm:$0xff] }
  0x81   :  { %v1471_v34 = vsub.f32 %v1837_v6, %v1343_v25  ;;  %v1480_v23 = vadd.f32 %v366_v42, %v1256_v48  ;;  %v1483_v15 = vadd.f32 %v367_v41, %v1259_v20  ;;  %v369_v52 = vadd.f32 %v361_v29, %v1238_v5  ;;  %v1491_v48 = vld [vmem:[#allocation2 + $0xc8] sm:$0xff]  ;;  %v1493_v20 = vld [vmem:[#allocation2 + $0xd0] sm:$0xff] }
  0x82   :  { %829 = vpow2.f32 %v453_v18  ;;  %v564_v25 = vunpack.c.l.bf16 %v560_v3  ;;  %v565_v9 = vunpack.c.h.bf16 %v560_v3  ;;  %v457_v12 = vmul.f32 1.442695, %v442_v55  ;;  %v1522_v42 = vld [vmem:[#allocation2 + $0xf0] sm:$0xff] }
  0x83   :  { %v566_v24 = vunpack.c.l.bf16 %v561_v44  ;;  %v567_v10 = vunpack.c.h.bf16 %v561_v44  ;;  %v568_v45 = vunpack.c.l.bf16 %v562_v11  ;;  %v1487_v51 = vadd.f32 %v368_v35, %v1838_v19 }
  0x84   :  { %831 = vpow2.f32 %v455_v47  ;;  %v569_v58 = vunpack.c.h.bf16 %v562_v11  ;;  %v570_v22 = vunpack.c.l.bf16 %v563_v1  ;;  %v1495_v5 = vpop.eup %819  ;;  %v571_v14 = vunpack.c.h.bf16 %v563_v1 }
  0x85   :  { %v572_v43 = vmax.f32 %v1489_v63, 0.0  ;;  %v573_v17 = vmax.f32 %v1491_v48, 0.0  ;;  %v574_v0 = vmax.f32 %v1493_v20, 0.0  ;;  %v1504_v21 = vpop.eup %821  ;;  %v575_v49 = vmax.f32 %v1497_v4, 0.0 }
  0x86   :  { %v576_v26 = vmax.f32 %v1499_v57, 0.0  ;;  %v580_v39 = vmul.f32 %v564_v25, %v1489_v63  ;;  %v581_v50 = vmul.f32 %v565_v9, %v1491_v48  ;;  %833 = vpow2.f32 %v457_v12 }
  0x87   :  { %v582_v2 = vmul.f32 %v566_v24, %v1493_v20  ;;  %v583_v46 = vmul.f32 %v567_v10, %v1497_v4  ;;  %v584_v56 = vmul.f32 %v568_v45, %v1499_v57  ;;  %v1515_v8 = vpop.eup %823  ;;  %v1518_v16 = vadd.f32 %v369_v52, %v1839_v60 }
  0x88   :  { %v459_v30 = vadd.f32 1.0, %v1495_v5  ;;  %v462_v31 = vmul.f32 -0.5, %v1495_v5  ;;  %v577_v41 = vmax.f32 %v1510_v59, 0.0  ;;  %v1527_v13 = vpop.eup %825  ;;  %v468_v61 = vadd.f32 1.0, %v1504_v21 }
  0x89   :  { %1840 = vst [vmem:[#allocation11_spill] sm:$0xff] %v1518_v16  ;;  %v585_v55 = vmul.f32 %v569_v58, %v1510_v59  ;;  %v1536_v35 = vmul.f32 %v570_v22, %v1522_v42  ;;  %v1539_v6 = vmul.f32 %v571_v14, %v1524_v27  ;;  %v1541_v47 = vsub.f32 %v572_v43, %v580_v39 }
  0x8a   :  { %v1533_v3 = vpop.eup %827  ;;  %v1543_v44 = vsub.f32 %v573_v17, %v581_v50  ;;  %v477_v11 = vadd.f32 1.0, %v1515_v8  ;;  %v1546_v1 = vsub.f32 %v574_v0, %v582_v2  ;;  %v1548_v52 = vsub.f32 %v575_v49, %v583_v46 }
  0x8b   :  { %v1550_v25 = vsub.f32 %v576_v26, %v584_v56  ;;  %835 = vlog2.f32 %v459_v30  ;;  %v463_v12 = vadd.f32 1.0, %v462_v31  ;;  %v471_v24 = vmul.f32 -0.5, %v1504_v21 }
  0x8c   :  { %v1552_v9 = vpop.eup %829  ;;  %v486_v10 = vadd.f32 1.0, %v1527_v13  ;;  %837 = vlog2.f32 %v468_v61  ;;  %v495_v45 = vadd.f32 1.0, %v1533_v3  ;;  %v596_v19 = vand.u32 2147483647, %v1489_v63 }
  0x8d   :  { %v597_v58 = vand.u32 2147483647, %v1491_v48  ;;  %v465_v14 = vand.u32 2147483647, %v1495_v5  ;;  %v480_v43 = vmul.f32 -0.5, %v1515_v8  ;;  %v1563_v17 = vsub.f32 %v577_v41, %v585_v55 }
  0x8e   :  { %v1559_v22 = vpop.eup %831  ;;  %v598_v0 = vand.u32 2147483647, %v1493_v20  ;;  %v474_v49 = vand.u32 2147483647, %v1504_v21  ;;  %839 = vlog2.f32 %v477_v11  ;;  %v504_v26 = vadd.f32 1.0, %v1552_v9 }
  0x8f   :  { %1842 = vst [vmem:[#allocation13_spill] sm:$0xff] %v1563_v17  ;;  %v599_v39 = vand.u32 2147483647, %v1497_v4  ;;  %v1570_v63 = vmul.f32 %v1495_v5, %v463_v12  ;;  %v472_v48 = vadd.f32 1.0, %v471_v24  ;;  %841 = vlog2.f32 %v486_v10 }
  0x90   :  { %v489_v50 = vmul.f32 -0.5, %v1527_v13  ;;  %v1573_v2 = vpop.eup %833  ;;  %v483_v46 = vand.u32 2147483647, %v1515_v8  ;;  %843 = vlog2.f32 %v495_v45  ;;  %v513_v20 = vadd.f32 1.0, %v1559_v22 }
  0x91   :  { %v600_v56 = vand.u32 2147483647, %v1499_v57  ;;  %v481_v60 = vadd.f32 1.0, %v480_v43  ;;  %v492_v30 = vand.u32 2147483647, %v1527_v13  ;;  %v498_v4 = vmul.f32 -0.5, %v1533_v3 }
  0x92   :  { %v604_v5 = vsub.f32 0.0, %v596_v19  ;;  %vm1580_vm0 = vcmp.lt.f32.partialorder %v465_v14, 0.0004427343  ;;  %vm1584_vm1 = vcmp.lt.f32.partialorder %v474_v49, 0.0004427343  ;;  %845 = vlog2.f32 %v504_v26 }
  0x93   :  { %v601_v61 = vand.u32 2147483647, %v1510_v59  ;;  %v605_v55 = vsub.f32 0.0, %v597_v58  ;;  %v606_v11 = vsub.f32 0.0, %v598_v0  ;;  %v490_v57 = vadd.f32 1.0, %v489_v50 }
  0x94   :  { %v522_v12 = vadd.f32 1.0, %v1573_v2  ;;  %v602_v24 = vand.u32 2147483647, %v1522_v42  ;;  %v607_v10 = vsub.f32 0.0, %v599_v39  ;;  %v473_v45 = vmul.f32 %v1504_v21, %v472_v48 }
  0x95   :  { %v501_v19 = vand.u32 2147483647, %v1533_v3  ;;  %847 = vlog2.f32 %v513_v20  ;;  %v608_v14 = vsub.f32 0.0, %v600_v56  ;;  %v836_v43 = vpop.eup %835  ;;  %v1594_v49 = vmul.f32 %v1515_v8, %v481_v60 }
  0x96   :  { %vm1596_vm2 = vcmp.lt.f32.partialorder %v483_v46, 0.0004427343  ;;  %vm1600_vm3 = vcmp.lt.f32.partialorder %v492_v30, 0.0004427343  ;;  %v499_v0 = vadd.f32 1.0, %v498_v4  ;;  %v838_v39 = vpop.eup %837  ;;  %v507_v48 = vmul.f32 -0.5, %v1552_v9 }
  0x97   :  { %v603_v26 = vand.u32 2147483647, %v1524_v27  ;;  %v612_v21 = vmul.f32 1.442695, %v604_v5  ;;  %v609_v50 = vsub.f32 0.0, %v601_v61  ;;  %v491_v8 = vmul.f32 %v1527_v13, %v490_v57 }
  0x98   :  { %v614_v20 = vmul.f32 1.442695, %v605_v55  ;;  %v616_v56 = vmul.f32 1.442695, %v606_v11  ;;  %849 = vlog2.f32 %v522_v12  ;;  %v610_v46 = vsub.f32 0.0, %v602_v24  ;;  %v840_v29 = vpop.eup %839 }
  0x99   :  { %v618_v60 = vmul.f32 1.442695, %v607_v10  ;;  %vm1607_vm4 = vcmp.lt.f32.partialorder %v501_v19, 0.0004427343  ;;  %v516_v4 = vmul.f32 -0.5, %v1559_v22  ;;  %851 = vpow2.f32 %v612_v21  ;;  %v842_v18 = vpop.eup %841 }
  0x9a   :  { %v620_v5 = vmul.f32 1.442695, %v608_v14  ;;  %v461_v16 = vmul.f32 0.6931472, %v836_v43  ;;  %v470_v17 = vmul.f32 0.6931472, %v838_v39  ;;  %853 = vpow2.f32 %v614_v20  ;;  %v844_v55 = vpop.eup %843 }
  0x9b   :  { %v611_v61 = vsub.f32 0.0, %v603_v26  ;;  %v510_v13 = vand.u32 2147483647, %v1552_v9  ;;  %v525_v11 = vmul.f32 -0.5, %v1573_v2  ;;  %855 = vpow2.f32 %v616_v56 }
  0x9c   :  { %v622_v57 = vmul.f32 1.442695, %v609_v50  ;;  %v500_v12 = vmul.f32 %v1533_v3, %v499_v0  ;;  %v508_v24 = vadd.f32 1.0, %v507_v48  ;;  %857 = vpow2.f32 %v618_v60  ;;  %v846_v19 = vpop.eup %845 }
  0x9d   :  { %v624_v10 = vmul.f32 1.442695, %v610_v46  ;;  %v479_v21 = vmul.f32 0.6931472, %v840_v29  ;;  %v488_v14 = vmul.f32 0.6931472, %v842_v18  ;;  %859 = vpow2.f32 %v620_v5 }
  0x9e   :  { %v517_v27 = vadd.f32 1.0, %v516_v4  ;;  %v467_v43 = vsel %vm1580_vm0, %v1570_v63, %v461_v16  ;;  %v476_v26 = vsel %vm1584_vm1, %v473_v45, %v470_v17  ;;  %v497_v39 = vmul.f32 0.6931472, %v844_v55 }
  0x9f   :  { %v626_v20 = vmul.f32 1.442695, %v611_v61  ;;  %v848_v50 = vpop.eup %847  ;;  %v519_v3 = vand.u32 2147483647, %v1559_v22  ;;  %v526_v0 = vadd.f32 1.0, %v525_v11  ;;  %861 = vpow2.f32 %v622_v57 }
  0xa0   :  { %v528_v48 = vand.u32 2147483647, %v1573_v2  ;;  %v506_v29 = vmul.f32 0.6931472, %v846_v19  ;;  %v509_v18 = vmul.f32 %v1552_v9, %v508_v24  ;;  %vm1623_vm5 = vcmp.lt.f32.partialorder %v510_v13, 0.0004427343 }
  0xa1   :  { %863 = vpow2.f32 %v624_v10  ;;  %v485_v16 = vsel %vm1596_vm2, %v1594_v49, %v479_v21  ;;  %v494_v17 = vsel %vm1600_vm3, %v491_v8, %v488_v14  ;;  %v531_v63 = vadd.f32 %v467_v43, %v1394_v33 }
  0xa2   :  { %v532_v31 = vadd.f32 %v476_v26, %v1408_v28  ;;  %v850_v41 = vpop.eup %849  ;;  %v503_v9 = vsel %vm1607_vm4, %v500_v12, %v497_v39  ;;  %v515_v45 = vmul.f32 0.6931472, %v848_v50  ;;  %v518_v46 = vmul.f32 %v1559_v22, %v517_v27 }
  0xa3   :  { %865 = vpow2.f32 %v626_v20  ;;  %v852_v60 = vpop.eup %851  ;;  %vm1637_vm6 = vcmp.lt.f32.partialorder %v519_v3, 0.0004427343  ;;  %v1642_v49 = vmul.f32 %v1573_v2, %v526_v0  ;;  %vm1644_vm7 = vcmp.lt.f32.partialorder %v528_v48, 0.0004427343 }
  0xa4   :  { %v1859_v28 = vmax.f32 %v1522_v42, 0.0  ;;  %v854_v58 = vpop.eup %853  ;;  %v512_v27 = vsel %vm1623_vm5, %v509_v18, %v506_v29  ;;  %v533_v22 = vadd.f32 %v485_v16, %v1413_v62  ;;  %v534_v8 = vadd.f32 %v494_v17, %v1426_v7 }
  0xa5   :  { %v628_v30 = vadd.f32 1.0, %v852_v60  ;;  %v856_v2 = vpop.eup %855  ;;  %v535_v5 = vadd.f32 %v503_v9, %v1437_v40  ;;  %v1659_v61 = vadd.f32 %v531_v63, %v1445_v53  ;;  %v1662_v55 = vadd.f32 %v532_v31, %v1465_v54 }
  0xa6   :  { %v1651_v59 = vsub.f32 %v1859_v28, %v1536_v35  ;;  %v637_v42 = vadd.f32 1.0, %v854_v58  ;;  %v858_v35 = vpop.eup %857  ;;  %v521_v13 = vsel %vm1637_vm6, %v518_v46, %v515_v45  ;;  %v1666_v11 = vmul.f32 0.6931472, %v850_v41 }
  0xa7   :  { %867 = vlog2.f32 %v628_v30  ;;  %v646_v62 = vadd.f32 1.0, %v856_v2  ;;  %v860_v7 = vpop.eup %859  ;;  %v536_v57 = vadd.f32 %v512_v27, %v1455_v36  ;;  %v631_v12 = vmul.f32 -0.5, %v852_v60 }
  0xa8   :  { %869 = vlog2.f32 %v637_v42  ;;  %v640_v40 = vmul.f32 -0.5, %v854_v58  ;;  %v1670_v53 = vadd.f32 %v533_v22, %v1474_v38  ;;  %v1673_v54 = vadd.f32 %v534_v8, %v1477_v37 }
  0xa9   :  { %871 = vlog2.f32 %v646_v62  ;;  %v655_v24 = vadd.f32 1.0, %v858_v35  ;;  %v1675_v10 = vpop.eup %861  ;;  %v1678_v19 = vadd.f32 %v521_v13, %v1460_v32  ;;  %v1681_v21 = vadd.f32 %v535_v5, %v1480_v23 }
  0xaa   :  { %v634_v36 = vand.u32 2147483647, %v852_v60  ;;  %v649_v14 = vmul.f32 -0.5, %v856_v2  ;;  %v643_v26 = vand.u32 2147483647, %v854_v58  ;;  %v658_v38 = vmul.f32 -0.5, %v858_v35 }
  0xab   :  { %v1683_v43 = vpop.eup %863  ;;  %873 = vlog2.f32 %v655_v24  ;;  %v664_v39 = vadd.f32 1.0, %v860_v7  ;;  %v530_v37 = vsel %vm1644_vm7, %v1642_v49, %v1666_v11  ;;  %v1690_v20 = vadd.f32 %v536_v57, %v1483_v15  ;;  %v1874_v49 = vld [vmem:[#allocation12_spill] sm:$0xff] }
  0xac   :  { %v632_v32 = vadd.f32 1.0, %v631_v12  ;;  %v641_v50 = vadd.f32 1.0, %v640_v40  ;;  %v652_v3 = vand.u32 2147483647, %v856_v2  ;;  %v667_v0 = vmul.f32 -0.5, %v860_v7 }
  0xad   :  { %v1692_v23 = vpop.eup %865  ;;  %875 = vlog2.f32 %v664_v39  ;;  %v673_v48 = vadd.f32 1.0, %v1675_v10  ;;  %vm1695_vm8 = vcmp.lt.f32.partialorder %v634_v36, 0.0004427343  ;;  %v650_v18 = vadd.f32 1.0, %v649_v14 }
  0xae   :  { %v661_v56 = vand.u32 2147483647, %v858_v35  ;;  %v682_v16 = vadd.f32 1.0, %v1683_v43  ;;  %vm1700_vm9 = vcmp.lt.f32.partialorder %v643_v26, 0.0004427343  ;;  %v659_v17 = vadd.f32 1.0, %v658_v38 }
  0xaf   :  { %877 = vlog2.f32 %v673_v48  ;;  %v676_v63 = vmul.f32 -0.5, %v1675_v10  ;;  %v633_v31 = vmul.f32 %v852_v60, %v632_v32  ;;  %v670_v41 = vand.u32 2147483647, %v860_v7 }
  0xb0   :  { %879 = vlog2.f32 %v682_v16  ;;  %v691_v9 = vadd.f32 1.0, %v1692_v23  ;;  %v642_v46 = vmul.f32 %v854_v58, %v641_v50  ;;  %vm1706_vm10 = vcmp.lt.f32.partialorder %v652_v3, 0.0004427343 }
  0xb1   :  { %v868_v45 = vpop.eup %867  ;;  %v668_v28 = vadd.f32 1.0, %v667_v0  ;;  %v685_v27 = vmul.f32 -0.5, %v1683_v43  ;;  %v651_v30 = vmul.f32 %v856_v2, %v650_v18  ;;  %vm1711_vm11 = vcmp.lt.f32.partialorder %v661_v56, 0.0004427343 }
  0xb2   :  { %v870_v22 = vpop.eup %869  ;;  %v630_v8 = vmul.f32 0.6931472, %v868_v45  ;;  %881 = vlog2.f32 %v691_v9  ;;  %v660_v13 = vmul.f32 %v858_v35, %v659_v17  ;;  %v677_v62 = vadd.f32 1.0, %v676_v63 }
  0xb3   :  { %v872_v60 = vpop.eup %871  ;;  %v639_v42 = vmul.f32 0.6931472, %v870_v22  ;;  %v694_v58 = vmul.f32 -0.5, %v1692_v23  ;;  %vm1718_vm12 = vcmp.lt.f32.partialorder %v670_v41, 0.0004427343  ;;  %v669_v14 = vmul.f32 %v860_v7, %v668_v28  ;;  %v1877_v28 = vld [vmem:[#allocation11_spill] sm:$0xff] }
  0xb4   :  { %v636_v57 = vsel %vm1695_vm8, %v633_v31, %v630_v8  ;;  %v648_v12 = vmul.f32 0.6931472, %v872_v60  ;;  %v679_v2 = vand.u32 2147483647, %v1675_v10  ;;  %v686_v26 = vadd.f32 1.0, %v685_v27 }
  0xb5   :  { %v874_v24 = vpop.eup %873  ;;  %v645_v36 = vsel %vm1700_vm9, %v642_v46, %v639_v42  ;;  %v700_v35 = vadd.f32 %v636_v57, %v1541_v47  ;;  %v688_v32 = vand.u32 2147483647, %v1683_v43  ;;  %v678_v0 = vmul.f32 %v1675_v10, %v677_v62 }
  0xb6   :  { %v654_v38 = vsel %vm1706_vm10, %v651_v30, %v648_v12  ;;  %v657_v39 = vmul.f32 0.6931472, %v874_v24  ;;  %v701_v50 = vadd.f32 %v645_v36, %v1543_v44  ;;  %v695_v48 = vadd.f32 1.0, %v694_v58 }
  0xb7   :  { %v876_v3 = vpop.eup %875  ;;  %v702_v29 = vadd.f32 %v654_v38, %v1546_v1  ;;  %v708_v18 = vadd.f32 %v700_v35, %v1659_v61  ;;  %v697_v56 = vand.u32 2147483647, %v1692_v23  ;;  %vm1737_vm13 = vcmp.lt.f32.partialorder %v679_v2, 0.0004427343 }
  0xb8   :  { %v663_v7 = vsel %vm1711_vm11, %v660_v13, %v657_v39  ;;  %v666_v47 = vmul.f32 0.6931472, %v876_v3  ;;  %v709_v16 = vadd.f32 %v701_v50, %v1662_v55  ;;  %v687_v44 = vmul.f32 %v1683_v43, %v686_v26 }
  0xb9   :  { %v878_v15 = vpop.eup %877  ;;  %v703_v10 = vadd.f32 %v663_v7, %v1548_v52  ;;  %v710_v1 = vadd.f32 %v702_v29, %v1670_v53  ;;  %716 = vst [vmem:[#allocation7] sm:$0xff] %v708_v18  ;;  %v538_v55 = vadd.f32 %v530_v37, %v1471_v34  ;;  %vm1752_vm14 = vcmp.lt.f32.partialorder %v688_v32, 0.0004427343 }
  0xba   :  { %v880_v61 = vpop.eup %879  ;;  %v672_v63 = vsel %vm1718_vm12, %v669_v14, %v666_v47  ;;  %v675_v31 = vmul.f32 0.6931472, %v878_v15  ;;  %717 = vst [vmem:[#allocation7 + $0x8] sm:$0xff] %v709_v16  ;;  %v696_v53 = vmul.f32 %v1692_v23, %v695_v48  ;;  %v545_v34 = vadd.f32 %v1678_v19, %v1487_v51 }
  0xbb   :  { %v684_v52 = vmul.f32 0.6931472, %v880_v61  ;;  %v704_v43 = vadd.f32 %v672_v63, %v1550_v25  ;;  %v711_v33 = vadd.f32 %v703_v10, %v1673_v54  ;;  %718 = vst [vmem:[#allocation7 + $0x10] sm:$0xff] %v710_v1  ;;  %v1875_v11 = vmax.f32 %v1874_v49, 0.0  ;;  %v1876_v25 = vld [vmem:[#allocation13_spill] sm:$0xff] }
  0xbc   :  { %v882_v9 = vpop.eup %881  ;;  %v681_v45 = vsel %vm1737_vm13, %v678_v0, %v675_v31  ;;  %vm698_vm15 = vcmp.lt.f32.partialorder %v697_v56, 0.0004427343  ;;  %v546_v27 = vadd.f32 %v538_v55, %v1877_v28 }
  0xbd   :  { %v595_v37 = vsub.f32 %v1875_v11, %v1539_v6  ;;  %v690_v23 = vsel %vm1752_vm14, %v687_v44, %v684_v52  ;;  %v693_v46 = vmul.f32 0.6931472, %v882_v9  ;;  %v705_v4 = vadd.f32 %v681_v45, %v1876_v25  ;;  %719 = vst [vmem:[#allocation7 + $0x18] sm:$0xff] %v711_v33 }
  0xbe   :  { %v712_v54 = vadd.f32 %v704_v43, %v1681_v21  ;;  %v706_v51 = vadd.f32 %v690_v23, %v1651_v59 }
  0xbf   :  { %v699_v19 = vsel %vm698_vm15, %v696_v53, %v693_v46  ;;  %v713_v6 = vadd.f32 %v705_v4, %v1690_v20 }
  0xc0   :  { %720 = vst [vmem:[#allocation7 + $0x20] sm:$0xff] %v712_v54  ;;  %v707_v22 = vadd.f32 %v699_v19, %v595_v37  ;;  %v714_v8 = vadd.f32 %v706_v51, %v545_v34 }
  0xc1   :  { %721 = vst [vmem:[#allocation7 + $0x28] sm:$0xff] %v713_v6 }
  0xc2   :  { %v715_v30 = vadd.f32 %v707_v22, %v546_v27  ;;  %722 = vst [vmem:[#allocation7 + $0x30] sm:$0xff] %v714_v8 }
  0xc4   :  { %723 = vst [vmem:[#allocation7 + $0x38] sm:$0xff] %v715_v30 }
  0xc5   :  { %938 = shalt.err (!%p935_p6)
}
  0xc6   :  { %s939_s12 = scalar_lea.hbm %s1790_s2, 1024 }
  0xc7   :  { %p940_p7 = scmp.ne.s32.totalorder %s1790_s2, %s939_s12  ;;  %p943_p8 = scmp.lt.u32.totalorder %s939_s12, %s1790_s2 }
  0xc9   :  { %p945_p9 = pnand %p943_p8, %p940_p7 }
  0xcb   :  { %948 = shalt.err (!%p945_p9)
}
  0xcc   :  { %735 = dma.vmem_to_hbm [thread:$0]  %s730_s8, 1024, %s1790_s2, [#allocation4], %s956_s19, %s956_s19, %s957_s20  }
  0xcd   :  { %953 = dma.done.wait [#allocation4], 1024  }
  0xce   :  { %954 = vsyncadd [#allocation4], 4294966272 }
  0xcf   :  { %739 = vsyncpa [#allocation3], 1 }
  0xd0   :  { %740 = vsyncpa [#allocation6], 1 }
  0xd1   :  { %741 = vsyncpa [#allocation4], 1 }

</bundles_post_ra>
